<compile_context>
chip_gen: v7x
topology: tpu7x:2x2x1
jax: 0.10.0
libtpu: 0.0.40
codegen_flags: <defaults>
</compile_context>

<pallas_src>
import jax
import jax.numpy as jnp
from jax.experimental import pallas as pl
from jax.experimental.pallas import tpu as pltpu

EPS = 1e-6


def _device_vmem_bytes():
    try:
        return int(pltpu.get_tpu_info().vmem_capacity_bytes)
    except Exception:
        return 64 << 20  # conservative (v7x per-TensorCore)


def _divisor_tile(dim, target, align):
    """Largest t <= target with t % align == 0 and dim % t == 0; else full dim."""
    if dim <= target:
        return dim
    t = (target // align) * align
    while t >= align:
        if dim % t == 0:
            return t
        t -= align
    return dim


def _reduce_tile(dim, cap, align):
    """Tile for the (mask-tolerant) reduction axis -> (tile, needs_mask)."""
    if dim <= cap:
        return dim, False
    t = (cap // align) * align
    while t >= align:
        if dim % t == 0:
            return t, False
        t -= align
    # No aligned divisor: ragged tile + masked last block.
    return max(align, (cap // align) * align), True


def _pick_tiles(bs, ch, hw, itemsize, target_bytes, channels_on_lanes):
    hw_align = 8 if channels_on_lanes else 128
    b_t = _divisor_tile(bs, 8, 8)
    # Spatial (reduction) tile, capped; masked if no aligned divisor exists.
    hw_t, hw_masked = _reduce_tile(hw, 2048, hw_align)
    # Channel tile (multiple of 128 for the lane-dense output) from the budget.
    ch_budget = max(128, target_bytes // max(1, b_t * hw_t * itemsize))
    ch_t = _divisor_tile(ch, ch_budget, 128)
    # If channels could not be split, rebalance by shrinking the spatial tile.
    if b_t * ch_t * hw_t * itemsize > 2 * target_bytes:
        hw_budget = max(hw_align, target_bytes // max(1, b_t * ch_t * itemsize))
        hw_t, hw_masked = _reduce_tile(hw, hw_budget, hw_align)
    # v7x megacore: expose >= 2 blocks on the parallel axes when legal.
    if (bs // b_t) * (ch // ch_t) < 2:
        if ch_t % 256 == 0 and ch % (ch_t // 2) == 0:
            ch_t //= 2
        elif b_t % 16 == 0 and bs % (b_t // 2) == 0:
            b_t //= 2
    return b_t, ch_t, hw_t, hw_masked


def _make_gem_kernel(hw_total, hw_t, reduce_axis, masked):
    inv_hw = 1.0 / float(hw_total)

    def gem_kernel(p_ref, x_ref, o_ref, acc_ref):
        # p_ref  : SMEM (1,)          -- learnable exponent p
        # x_ref  : VMEM input tile    -- (B_T, CH_T, HW_T) or (B_T, HW_T, CH_T)
        # o_ref  : VMEM (B_T, CH_T)   -- pooled output block (lane-dense)
        # acc_ref: VMEM (B_T, CH_T)   -- f32 partial-sum accumulator
        k = pl.program_id(2)

        @pl.when(k == 0)
        def _zero():
            acc_ref[...] = jnp.zeros_like(acc_ref)

        p = p_ref[0]
        x = x_ref[...].astype(jnp.float32)
        xc = jnp.maximum(x, EPS)                  # clamp(min=eps)
        xp = jnp.exp(p * jnp.log(xc))             # xc ** p (xc > 0, dynamic exponent)
        if masked:
            idx = jax.lax.broadcasted_iota(jnp.int32, xp.shape, reduce_axis)
            xp = jnp.where(k * hw_t + idx < hw_total, xp, 0.0)
        acc_ref[...] += jnp.sum(xp, axis=reduce_axis)

        @pl.when(k == pl.num_programs(2) - 1)
        def _finalize():
            inv_p = 1.0 / p                       # scalar reciprocal, once per block
            m = acc_ref[...] * inv_hw             # mean over the TRUE H*W
            o_ref[...] = jnp.exp(jnp.log(m) * inv_p).astype(o_ref.dtype)

    return gem_kernel


def gem_forward(x, p, *, data_format="NCHW"):
    """GeM pooling.  x: (bs,ch,h,w) if NCHW or (bs,h,w,ch) if NHWC; p: (1,) f32.

    Returns (bs, ch) in x.dtype.  bf16 inputs are accepted (f32 accumulation).
    """
    if data_format == "NCHW":
        bs, ch, h, w = x.shape
        hw = h * w
        x_r = x.reshape(bs, ch, hw)
        channels_on_lanes = False
    elif data_format == "NHWC":
        bs, h, w, ch = x.shape
        hw = h * w
        x_r = x.reshape(bs, hw, ch)
        channels_on_lanes = True
    else:
        raise ValueError(f"unsupported data_format: {data_format}")

    itemsize = jnp.dtype(x.dtype).itemsize
    device_vmem = _device_vmem_bytes()
    target_bytes = (16 << 20) if device_vmem >= (96 << 20) else (6 << 20)

    b_t, ch_t, hw_t, hw_masked = _pick_tiles(
        bs, ch, hw, itemsize, target_bytes, channels_on_lanes)
    grid = (bs // b_t, ch // ch_t, pl.cdiv(hw, hw_t))

    if channels_on_lanes:
        in_block = (b_t, hw_t, ch_t)
        in_map = lambda b, c, k: (b, k, c)
        reduce_axis = 1
    else:
        in_block = (b_t, ch_t, hw_t)
        in_map = lambda b, c, k: (b, c, k)
        reduce_axis = 2

    # Explicit VMEM budget: double-buffered input + output + accumulator + margin,
    # clamped to 3/4 of the device's per-core VMEM (v7x-safe).
    in_block_bytes = b_t * ch_t * hw_t * itemsize
    out_block_bytes = b_t * ch_t * itemsize
    acc_bytes = b_t * ch_t * 4
    vmem_bytes = 2 * in_block_bytes + 2 * out_block_bytes + acc_bytes + (2 << 20)
    vmem_bytes = int(min(max(vmem_bytes, 4 << 20), (device_vmem * 3) // 4))

    n = bs * ch * hw
    cost = pl.CostEstimate(
        flops=4 * n + 2 * bs * ch,
        transcendentals=2 * n + 2 * bs * ch,       # log + exp per element
        bytes_accessed=n * itemsize + bs * ch * itemsize,
    )

    return pl.pallas_call(
        _make_gem_kernel(hw, hw_t, reduce_axis, hw_masked),
        out_shape=jax.ShapeDtypeStruct((bs, ch), x.dtype),
        grid=grid,
        in_specs=[
            pl.BlockSpec(memory_space=pltpu.MemorySpace.SMEM),  # p (scalar)
            pl.BlockSpec(in_block, in_map),                     # input tile
        ],
        out_specs=pl.BlockSpec((b_t, ch_t), lambda b, c, k: (b, c)),
        scratch_shapes=[pltpu.VMEM((b_t, ch_t), jnp.float32)],
        compiler_params=pltpu.CompilerParams(
            dimension_semantics=("parallel", "parallel", "arbitrary"),
            vmem_limit_bytes=vmem_bytes,
        ),
        cost_estimate=cost,
    )(p, x_r)


def gem_reference(x, p, data_format="NCHW"):
    axes = (-2, -1) if data_format == "NCHW" else (1, 2)
    xf = x.astype(jnp.float32)
    xc = jnp.maximum(xf, EPS)
    m = jnp.mean(xc ** p[0], axis=axes)
    return (m ** (1.0 / p[0])).astype(x.dtype)


if __name__ == "__main__":
    keys = jax.random.split(jax.random.PRNGKey(0), 5)
    # Deterministic parameter init, matching nn.Parameter(torch.ones(1) * 3).
    p = jnp.ones((1,), dtype=jnp.float32) * 3.0

    # 1) Small NCHW shape consistent with the module (single-step grid).
    x = jax.random.uniform(keys[0], (2, 4, 16, 16), dtype=jnp.float32)
    out = gem_forward(x, p)
    jax.block_until_ready(out)
    ref = gem_reference(x, p)
    assert out.shape == (2, 4)
    assert jnp.allclose(out, ref, atol=1e-4, rtol=1e-4)

    # 2) Small-spatial NHWC head (7x7): channels on lanes, hw on sublanes.
    x_nhwc = jax.random.uniform(keys[1], (2, 7, 7, 256), dtype=jnp.float32)
    out_nhwc = gem_forward(x_nhwc, p, data_format="NHWC")
    jax.block_until_ready(out_nhwc)
    ref_nhwc = gem_reference(x_nhwc, p, data_format="NHWC")
    assert out_nhwc.shape == (2, 256)
    assert jnp.allclose(out_nhwc, ref_nhwc, atol=1e-4, rtol=1e-4)

    # 3) NCHW with channel tiling + megacore split of the parallel axes.
    x2 = jax.random.uniform(keys[2], (4, 256, 32, 32), dtype=jnp.float32)
    out2 = gem_forward(x2, p)
    jax.block_until_ready(out2)
    ref2 = gem_reference(x2, p)
    assert out2.shape == (4, 256)
    assert jnp.allclose(out2, ref2, atol=1e-4, rtol=1e-4)

    # 4) Ragged spatial extent (50x50 = 2500): masked last reduction tile.
    x3 = jax.random.uniform(keys[3], (2, 128, 50, 50), dtype=jnp.float32)
    out3 = gem_forward(x3, p)
    jax.block_until_ready(out3)
    ref3 = gem_reference(x3, p)
    assert out3.shape == (2, 128)
    assert jnp.allclose(out3, ref3, atol=1e-4, rtol=1e-4)

    # 5) bf16 input path (kernel upcasts and accumulates in f32).
    x4 = jax.random.uniform(keys[4], (2, 256, 16, 16), dtype=jnp.float32)
    x4 = x4.astype(jnp.bfloat16)
    out4 = gem_forward(x4, p)
    jax.block_until_ready(out4)
    ref4 = gem_reference(x4, p)
    assert out4.shape == (2, 256)
    assert jnp.allclose(out4.astype(jnp.float32), ref4.astype(jnp.float32),
                        atol=2e-2, rtol=2e-2)

    print("KERNEL_OK")
</pallas_src>

<mosaic_0001>
module attributes {stable_mosaic.version = 11 : i64} {
  func.func @gem_kernel(%arg0: i32, %arg1: i32, %arg2: i32, %arg3: memref<1xf32, #tpu.memory_space<smem>>, %arg4: memref<2x4x256xf32, #tpu.memory_space<vmem>>, %arg5: memref<2x4xf32, #tpu.memory_space<vmem>>, %arg6: memref<2x4xf32, #tpu.memory_space<vmem>>) attributes {dimension_semantics = [#tpu.dimension_semantics<parallel>, #tpu.dimension_semantics<parallel>, #tpu.dimension_semantics<arbitrary>], iteration_bounds = array<i64: 1, 1, 1>, scalar_prefetch = 0 : i64, scratch_operands = 1 : i64, tpu.core_type = #tpu.core_type<tc>, window_params = [{transform_indices = @transform_0, window_bounds = array<i64: 1>}, {transform_indices = @transform_1, window_bounds = array<i64: 2, 4, 256>}, {transform_indices = @transform_2, window_bounds = array<i64: 2, 4>}]} {
    %c0_i32 = arith.constant 0 : i32
    %0 = arith.cmpi eq, %arg2, %c0_i32 : i32
    %1 = arith.extui %0 : i1 to i32
    %c0_i32_0 = arith.constant 0 : i32
    %2 = arith.cmpi ne, %1, %c0_i32_0 : i32
    scf.if %2 {
      %cst_11 = arith.constant 0.000000e+00 : f32
      %18 = vector.broadcast %cst_11 : f32 to vector<2x4xf32>
      %c0_12 = arith.constant 0 : index
      %c0_13 = arith.constant 0 : index
      %19 = vector.load %arg6[%c0_12, %c0_13] : memref<2x4xf32, #tpu.memory_space<vmem>>, vector<2x4xf32>
      tpu.vector_store %arg6[%c0_12, %c0_13], %18 {strides = array<i32>} : memref<2x4xf32, #tpu.memory_space<vmem>>, vector<2x4xf32>,
    } else {
    }
    %c0 = arith.constant 0 : index
    %3 = memref.load %arg3[%c0] : memref<1xf32, #tpu.memory_space<smem>>
    %c0_1 = arith.constant 0 : index
    %c0_2 = arith.constant 0 : index
    %c0_3 = arith.constant 0 : index
    %4 = vector.load %arg4[%c0_1, %c0_2, %c0_3] : memref<2x4x256xf32, #tpu.memory_space<vmem>>, vector<2x4x256xf32>
    %cst = arith.constant 9.99999997E-7 : f32
    %5 = vector.broadcast %cst : f32 to vector<2x4x256xf32>
    %6 = arith.maximumf %4, %5 : vector<2x4x256xf32>
    %7 = math.log %6 : vector<2x4x256xf32>
    %8 = vector.broadcast %3 : f32 to vector<2x4x256xf32>
    %9 = arith.mulf %8, %7 : vector<2x4x256xf32>
    %10 = math.exp %9 : vector<2x4x256xf32>
    %c0_4 = arith.constant 0 : index
    %c0_5 = arith.constant 0 : index
    %11 = vector.load %arg6[%c0_4, %c0_5] : memref<2x4xf32, #tpu.memory_space<vmem>>, vector<2x4xf32>
    %cst_6 = arith.constant dense<0.000000e+00> : vector<2x4xf32>
    %12 = vector.multi_reduction <add>, %10, %cst_6 [2] : vector<2x4x256xf32> to vector<2x4xf32>
    %13 = arith.addf %11, %12 : vector<2x4xf32>
    %c0_7 = arith.constant 0 : index
    %c0_8 = arith.constant 0 : index
    %14 = vector.load %arg6[%c0_7, %c0_8] : memref<2x4xf32, #tpu.memory_space<vmem>>, vector<2x4xf32>
    tpu.vector_store %arg6[%c0_7, %c0_8], %13 {strides = array<i32>} : memref<2x4xf32, #tpu.memory_space<vmem>>, vector<2x4xf32>,
    %c0_i32_9 = arith.constant 0 : i32
    %15 = arith.cmpi eq, %arg2, %c0_i32_9 : i32
    %16 = arith.extui %15 : i1 to i32
    %c0_i32_10 = arith.constant 0 : i32
    %17 = arith.cmpi ne, %16, %c0_i32_10 : i32
    scf.if %17 {
      %cst_11 = arith.constant 1.000000e+00 : f32
      %18 = arith.divf %cst_11, %3 : f32
      %c0_12 = arith.constant 0 : index
      %c0_13 = arith.constant 0 : index
      %19 = vector.load %arg6[%c0_12, %c0_13] : memref<2x4xf32, #tpu.memory_space<vmem>>, vector<2x4xf32>
      %cst_14 = arith.constant 3.906250e-03 : f32
      %20 = vector.broadcast %cst_14 : f32 to vector<2x4xf32>
      %21 = arith.mulf %19, %20 : vector<2x4xf32>
      %22 = math.log %21 : vector<2x4xf32>
      %23 = vector.broadcast %18 : f32 to vector<2x4xf32>
      %24 = arith.mulf %22, %23 : vector<2x4xf32>
      %25 = math.exp %24 : vector<2x4xf32>
      %c0_15 = arith.constant 0 : index
      %c0_16 = arith.constant 0 : index
      %26 = vector.load %arg5[%c0_15, %c0_16] : memref<2x4xf32, #tpu.memory_space<vmem>>, vector<2x4xf32>
      tpu.vector_store %arg5[%c0_15, %c0_16], %25 {strides = array<i32>} : memref<2x4xf32, #tpu.memory_space<vmem>>, vector<2x4xf32>,
    } else {
    }
    return
  }
  func.func @transform_0(%arg0: i32, %arg1: i32, %arg2: i32) -> i32 {
    %c0_i32 = arith.constant 0 : i32
    %c0_i32_0 = arith.constant 0 : i32
    return %c0_i32 : i32
  }
  func.func @transform_1(%arg0: i32, %arg1: i32, %arg2: i32) -> (i32, i32, i32) {
    %c0_i32 = arith.constant 0 : i32
    return %arg0, %arg1, %arg2 : i32, i32, i32
  }
  func.func @transform_2(%arg0: i32, %arg1: i32, %arg2: i32) -> (i32, i32) {
    %c0_i32 = arith.constant 0 : i32
    return %arg0, %arg1 : i32, i32
  }
}

</mosaic_0001>

<bundles_post_ra>
// kernel: tpu_custom_call.1
= control target key start
LH: loop header
LB: loop body
LE: loop exit
PB: predicated region body
PF: predicated region fallthrough
CT: control target
= control target key end

     0   :  { %8 = vsyncpa [#allocation5], 0  ;;  %s234_s0 = inlined_call_operand.<no memory space> [shape: f32[1], index: 0, kind: input, shape index: {}]   ;;  %s235_s1 = inlined_call_operand.hbm [shape: f32[2,4,256], index: 1, kind: input, shape index: {}]   ;;  %s236_s2 = inlined_call_operand.hbm [shape: f32[2,4], index: 2, kind: output, shape index: {}]  }
   0x1   :  { %9 = vsyncpa [#allocation6], 0  ;;  %s184_s9 = smov [#allocation4]   ;;  %s136_s13 = scalar_lea.hbm %s235_s1, 256 }
   0x2   :  { %s17_s10 = sshll.u32 %s184_s9, 4  ;;  %p137_p0 = scmp.ne.s32.totalorder %s235_s1, %s136_s13  ;;  %s18_s10 = int_to_ptr.vmem [resolvable:$true] %s17_s10 }
   0x3   :  { %p140_p1 = scmp.lt.u32.totalorder %s136_s13, %s235_s1 }
   0x5   :  { %p142_p2 = pnand %p140_p1, %p137_p0 }
   0x7   :  { %145 = shalt.err (!%p142_p2)
}
   0x8   :  { %s146_s18 = scalar_lea.vmem %s18_s10, 256  ;;  %p151_p4 = scmp.lt.s32.totalorder %s18_s10, %s18_s10 }
   0x9   :  { %p147_p3 = scmp.ne.s32.totalorder %s18_s10, %s146_s18  ;;  %p152_p5 = scmp.lt.s32.totalorder %s146_s18, %s146_s18 }
   0xb   :  { %p153_p6 = por %p152_p5, %p151_p4 }
   0xd   :  { %p154_p7 = pnand %p153_p6, %p147_p3 }
   0xf   :  { %157 = shalt.err (!%p154_p7)
}
  0x10   :  { %s185_s19 = smov 128   ;;  %s186_s20 = smov 8  }
  0x11   :  { %23 = dma.hbm_to_vmem [thread:$0]  %s235_s1, 256, %s18_s10, [#allocation5], %s185_s19, %s185_s19, %s186_s20  }
  0x12   :  { %180 = dma.done.wait [#allocation5], 256  }
  0x13   :  { %181 = vsyncadd [#allocation5], 4294967040  ;;  %v42_v0 = vstv %s234_s0  ;;  %v34_v1 = vld [vmem:[#allocation4] sm:$0xff]  ;;  %v35_v2 = vld [vmem:[#allocation4 + $0x8] sm:$0xff]  ;;  %vm56_vm0 = vcmask 1043456   ;;  %vm31_vm1 = vcmask 25600   ;;  %v69_v25 = vlaneseq }
  0x14   :  { %122 = vrcp.f32 %v42_v0  ;;  %v36_v3 = vmax.f32 %v34_v1, 1e-06  ;;  %v37_v4 = vmax.f32 %v35_v2, 1e-06  ;;  %v187_v24 = vmov 0.0   ;;  %s188_s1 = smov [#allocation7]  }
  0x15   :  { %32 = vst.msk [vmem:[#allocation2] sm:$0x3] %vm31_vm1, %v187_v24  ;;  %v70_v26 = vand.u32 127, %v69_v25  ;;  %v72_v27 = vshrl.u32 %v69_v25, 7  ;;  %vm79_vm2 = vcmask 1041409   ;;  %s106_s25 = sshll.u32 %s188_s1, 4  ;;  %s107_s25 = int_to_ptr.vmem [resolvable:$true] %s106_s25 }
  0x16   :  { %124 = vlog2.f32 %v36_v3  ;;  %s158_s26 = scalar_lea.vmem %s107_s25, 32  ;;  %p163_p9 = scmp.lt.s32.totalorder %s107_s25, %s107_s25 }
  0x17   :  { %126 = vlog2.f32 %v37_v4  ;;  %v73_v29 = vsub.s32 %v70_v26, %v72_v27  ;;  %p159_p8 = scmp.ne.s32.totalorder %s107_s25, %s158_s26  ;;  %p164_p10 = scmp.lt.s32.totalorder %s158_s26, %s158_s26 }
  0x19   :  { %p165_p11 = por %p164_p10, %p163_p9 }
  0x1b   :  { %p166_p12 = pnand %p165_p11, %p159_p8 }
  0x1c   :  { %v49_v33 = vld [vmem:[#allocation2] sm:$0x3] }
  0x1e   :  { %v123_v5 = vpop.eup %122 }
  0x1f   :  { %115 = vpush %v123_v5 }
  0x20   :  { %v125_v6 = vpop.eup %124 }
  0x21   :  { %v127_v7 = vpop.eup %126  ;;  %v39_v8 = vmul.f32 0.6931472, %v125_v6 }
  0x22   :  { %v41_v9 = vmul.f32 0.6931472, %v127_v7 }
  0x23   :  { %v43_v10 = vmul.f32 %v42_v0, %v39_v8 }
  0x24   :  { %v44_v11 = vmul.f32 %v42_v0, %v41_v9 }
  0x25   :  { %v45_v12 = vmul.f32 1.442695, %v43_v10 }
  0x26   :  { %v47_v13 = vmul.f32 1.442695, %v44_v11 }
  0x27   :  { %128 = vpow2.f32 %v45_v12 }
  0x28   :  { %130 = vpow2.f32 %v47_v13 }
  0x31   :  { %v129_v14 = vpop.eup %128 }
  0x32   :  { %v131_v15 = vpop.eup %130  ;;  %v52_v16 = vcombine.high %v129_v14, %v129_v14  ;;  %v57_v17 = vsel %vm56_vm0, %v129_v14, 0.0 }
  0x33   :  { %v53_v18 = vcombine.high %v131_v15, %v131_v15  ;;  %v62_v20 = vsel %vm56_vm0, %v131_v15, 0.0 }
  0x34   :  { %v58_v19 = vsel %vm56_vm0, %v52_v16, 0.0 }
  0x35   :  { %v59_v21 = vadd.f32 %v58_v19, %v57_v17  ;;  %v63_v22 = vsel %vm56_vm0, %v53_v18, 0.0 }
  0x36   :  { %v64_v23 = vadd.f32 %v63_v22, %v62_v20 }
  0x37   :  { %60 = vadd.xlane.f32.xlu0 %v59_v21 }
  0x3b   :  { %65 = vadd.xlane.f32.xlu0 %v64_v23 }
  0x50   :  { %s116_s0 = spop %115 }
  0x51   :  { %v95_v39 = vstv %s116_s0 }
  0xc4   :  { %v61_v28 = vpop.xlane.xlu0 %60 }
  0xc5   :  { %v74_v31 = vrot.slane %v61_v28, %v73_v29 }
  0xc8   :  { %v66_v30 = vpop.xlane.xlu0 %65 }
  0xc9   :  { %v78_v32 = vrot.slane %v66_v30, %v73_v29 }
  0xcb   :  { %v80_v34 = vsel %vm79_vm2, %v78_v32, %v74_v31 }
  0xcc   :  { %v82_v35 = vadd.f32 %v80_v34, %v49_v33 }
  0xce   :  { %84 = vst.msk [vmem:[#allocation2] sm:$0x3] %vm31_vm1, %v82_v35 }
  0xd5   :  { %v91_v36 = vld [vmem:[#allocation2] sm:$0x3] }
  0xd6   :  { %v92_v37 = vmul.f32 0.00390625, %v91_v36 }
  0xd8   :  { %132 = vlog2.f32 %v92_v37 }
  0xe2   :  { %v133_v38 = vpop.eup %132 }
  0xe3   :  { %v94_v40 = vmul.f32 0.6931472, %v133_v38 }
  0xe5   :  { %v96_v41 = vmul.f32 %v95_v39, %v94_v40 }
  0xe7   :  { %v97_v42 = vmul.f32 1.442695, %v96_v41 }
  0xe9   :  { %134 = vpow2.f32 %v97_v42 }
  0xf3   :  { %v135_v43 = vpop.eup %134 }
  0xf4   :  { %99 = vst.msk [vmem:[#allocation7] sm:$0x3] %vm31_vm1, %v135_v43 }
  0xf5   :  { %169 = shalt.err (!%p166_p12)
}
  0xf6   :  { %s170_s29 = scalar_lea.hbm %s236_s2, 32 }
  0xf7   :  { %p171_p13 = scmp.ne.s32.totalorder %s236_s2, %s170_s29  ;;  %p174_p0 = scmp.lt.u32.totalorder %s170_s29, %s236_s2 }
  0xf9   :  { %p176_p1 = pnand %p174_p0, %p171_p13 }
  0xfb   :  { %179 = shalt.err (!%p176_p1)
}
  0xfc   :  { %109 = dma.vmem_to_hbm [thread:$0]  %s107_s25, 32, %s236_s2, [#allocation6]  }
  0xfd   :  { %182 = dma.done.wait [#allocation6], 32  }
  0xfe   :  { %183 = vsyncadd [#allocation6], 4294967264 }
  0xff   :  { %113 = vsyncpa [#allocation5], 1 }
 0x100   :  { %114 = vsyncpa [#allocation6], 1 }

</bundles_post_ra>
